<compile_context>
chip_gen: v7x
topology: tpu7x:2x2x1
jax: 0.10.0
libtpu: 0.0.40
codegen_flags: <defaults>
</compile_context>

<pallas_src>
import jax
import jax.numpy as jnp
from jax.experimental import pallas as pl
from jax.experimental.pallas import tpu as pltpu

EPS = 1e-5


def _vmem_capacity_bytes():
    try:
        return int(pltpu.get_tpu_info().vmem_capacity_bytes)
    except Exception:
        return 128 * 1024 * 1024  # conservative fallback (v5e/v6e size)


_VMEM_CAP = _vmem_capacity_bytes()
# ~48 MiB scoped limit on v7x (64 MiB physical), 64 MiB on v5e/v6e (128 MiB physical).
VMEM_LIMIT = min((_VMEM_CAP * 3) // 4, 64 * 1024 * 1024)
# Whole-problem-resident single kernel below this (~12 MiB v7x, ~16 MiB v5e/v6e).
FUSED_VMEM_BUDGET = VMEM_LIMIT // 4


# --------------------------------------------------------------------------- #
# In-kernel helper: training-mode BatchNorm folded to one scale + shift
# --------------------------------------------------------------------------- #
def _bn_fold(h, gamma, beta):
    """h: (B, T) f32, gamma/beta: (1, T) f32. Batch mean, biased variance."""
    m = jnp.mean(h, axis=0, keepdims=True)
    c = h - m
    v = jnp.mean(c * c, axis=0, keepdims=True)
    scale = gamma * jax.lax.rsqrt(v + EPS)        # rsqrt -> EUP (free slot)
    return c * scale + beta


# --------------------------------------------------------------------------- #
# Fused kernels (no grid, everything VMEM-resident) — small / unaligned shapes
# --------------------------------------------------------------------------- #
def _fused_proj_kernel(x_ref, w1_ref, g1_ref, be1_ref, ws_ref, gs_ref, bes_ref,
                       w2_ref, g2_ref, be2_ref, o_ref):
    x = x_ref[...]                                  # f32
    xm = x.astype(w1_ref.dtype)                     # matmul operand dtype
    h1 = jnp.maximum(_bn_fold(jnp.dot(xm, w1_ref[...],
                                      preferred_element_type=jnp.float32),
                              g1_ref[...], be1_ref[...]), 0.0)
    sc = _bn_fold(jnp.dot(xm, ws_ref[...], preferred_element_type=jnp.float32),
                  gs_ref[...], bes_ref[...])        # f32 shortcut
    h2 = jnp.dot(h1.astype(w2_ref.dtype), w2_ref[...],
                 preferred_element_type=jnp.float32)
    o_ref[...] = jnp.maximum(_bn_fold(h2, g2_ref[...], be2_ref[...]) + sc,
                             0.0).astype(o_ref.dtype)


def _fused_id_kernel(x_ref, w1_ref, g1_ref, be1_ref, w2_ref, g2_ref, be2_ref, o_ref):
    x = x_ref[...]                                  # f32 identity shortcut
    h1 = jnp.maximum(_bn_fold(jnp.dot(x.astype(w1_ref.dtype), w1_ref[...],
                                      preferred_element_type=jnp.float32),
                              g1_ref[...], be1_ref[...]), 0.0)
    h2 = jnp.dot(h1.astype(w2_ref.dtype), w2_ref[...],
                 preferred_element_type=jnp.float32)
    o_ref[...] = jnp.maximum(_bn_fold(h2, g2_ref[...], be2_ref[...]) + x,
                             0.0).astype(o_ref.dtype)


# --------------------------------------------------------------------------- #
# Single tiled kernel (grid over output-feature tiles, h1 resident in VMEM)
# --------------------------------------------------------------------------- #
def _tiled_proj_kernel(x_ref, w1_ref, g1_ref, be1_ref, ws_ref, gs_ref, bes_ref,
                       w2_ref, g2_ref, be2_ref, o_ref, h1_s):
    xm = x_ref[...].astype(w1_ref.dtype)

    @pl.when(pl.program_id(0) == 0)
    def _():
        # h1 = relu(BN1(x @ W1)) computed once, kept resident for all N tiles.
        h = jnp.dot(xm, w1_ref[...], preferred_element_type=jnp.float32)
        h1_s[...] = jnp.maximum(_bn_fold(h, g1_ref[...], be1_ref[...]),
                                0.0).astype(h1_s.dtype)

    # Projection shortcut for this tile only (exact: full batch per feature tile).
    sc = _bn_fold(jnp.dot(xm, ws_ref[...], preferred_element_type=jnp.float32),
                  gs_ref[...], bes_ref[...])        # f32
    h2 = jnp.dot(h1_s[...], w2_ref[...], preferred_element_type=jnp.float32)
    o_ref[...] = jnp.maximum(_bn_fold(h2, g2_ref[...], be2_ref[...]) + sc,
                             0.0).astype(o_ref.dtype)


def _tiled_id_kernel(x_ref, xsc_ref, w1_ref, g1_ref, be1_ref,
                     w2_ref, g2_ref, be2_ref, o_ref, h1_s):
    @pl.when(pl.program_id(0) == 0)
    def _():
        h = jnp.dot(x_ref[...].astype(w1_ref.dtype), w1_ref[...],
                    preferred_element_type=jnp.float32)
        h1_s[...] = jnp.maximum(_bn_fold(h, g1_ref[...], be1_ref[...]),
                                0.0).astype(h1_s.dtype)

    h2 = jnp.dot(h1_s[...], w2_ref[...], preferred_element_type=jnp.float32)
    sc = xsc_ref[...].astype(jnp.float32)           # identity shortcut tile, f32
    o_ref[...] = jnp.maximum(_bn_fold(h2, g2_ref[...], be2_ref[...]) + sc,
                             0.0).astype(o_ref.dtype)


# --------------------------------------------------------------------------- #
# Wrappers
# --------------------------------------------------------------------------- #
def _pick_tile(B, in_dim, out_dim, isz, has_proj, max_tn=None):
    """Largest multiple-of-128 divisor of out_dim whose streamed (double-buffered)
    tiles fit the scoped-VMEM budget left after the resident blocks."""
    fixed = (2 * (B * in_dim * 4 + in_dim * out_dim * isz + 2 * out_dim * 4)
             + B * out_dim * isz)                   # x, W1, g1/be1 (x2 buf) + h1 scratch
    budget = max(VMEM_LIMIT - fixed, 2 * 1024 * 1024)
    per_col = 2 * (out_dim * isz + B * 4 + 16)      # W2 tile + out tile + g2/be2
    per_col += 2 * (in_dim * isz + 16) if has_proj else 2 * (B * 4)
    cap = out_dim if max_tn is None else min(max_tn, out_dim)
    best, t = 128, 128
    while t <= cap:
        if out_dim % t == 0 and t * per_col <= budget:
            best = t
        t += 128
    return best


def _fused_call(x, p, B, in_dim, out_dim, has_proj):
    vmem = pl.BlockSpec(memory_space=pltpu.MemorySpace.VMEM)
    if has_proj:
        kernel = _fused_proj_kernel
        args = (x, p["w1"], p["g1"], p["be1"], p["ws"], p["gs"], p["bes"],
                p["w2"], p["g2"], p["be2"])
    else:
        kernel = _fused_id_kernel
        args = (x, p["w1"], p["g1"], p["be1"], p["w2"], p["g2"], p["be2"])
    cost = pl.CostEstimate(
        flops=2 * B * in_dim * out_dim * (2 if has_proj else 1) + 2 * B * out_dim * out_dim,
        transcendentals=(3 if has_proj else 2) * out_dim,
        bytes_accessed=sum(int(a.size) * a.dtype.itemsize for a in args) + B * out_dim * 4)
    return pl.pallas_call(
        kernel,
        out_shape=jax.ShapeDtypeStruct((B, out_dim), jnp.float32),
        in_specs=[vmem] * len(args),
        out_specs=vmem,
        compiler_params=pltpu.CompilerParams(vmem_limit_bytes=VMEM_LIMIT),
        cost_estimate=cost,
    )(*args)


def _tiled_call(x, p, B, in_dim, out_dim, has_proj, tn):
    cd = p["w1"].dtype
    n_tiles = out_dim // tn

    def res(shape):                                 # constant-index resident block
        return pl.BlockSpec(shape, lambda j: (0, 0))

    def col(shape):                                 # streamed output-column tile
        return pl.BlockSpec(shape, lambda j: (0, j))

    if has_proj:
        kernel = _tiled_proj_kernel
        in_specs = [res((B, in_dim)), res((in_dim, out_dim)),
                    res((1, out_dim)), res((1, out_dim)),
                    col((in_dim, tn)), col((1, tn)), col((1, tn)),
                    col((out_dim, tn)), col((1, tn)), col((1, tn))]
        args = (x, p["w1"], p["g1"], p["be1"], p["ws"], p["gs"], p["bes"],
                p["w2"], p["g2"], p["be2"])
    else:
        kernel = _tiled_id_kernel
        in_specs = [res((B, in_dim)), col((B, tn)),
                    res((in_dim, out_dim)), res((1, out_dim)), res((1, out_dim)),
                    col((out_dim, tn)), col((1, tn)), col((1, tn))]
        args = (x, x, p["w1"], p["g1"], p["be1"], p["w2"], p["g2"], p["be2"])

    cost = pl.CostEstimate(
        flops=2 * B * in_dim * out_dim * (2 if has_proj else 1) + 2 * B * out_dim * out_dim,
        transcendentals=(3 if has_proj else 2) * out_dim,
        bytes_accessed=sum(int(a.size) * a.dtype.itemsize for a in args) + B * out_dim * 4)

    # TODO(synk): on v7x, mark the constant-index resident specs with
    # pipeline_mode=pl.Buffered(1) (single buffer) once verified on the target
    # jax build, and/or split the N-tile axis across the two TensorCores.
    return pl.pallas_call(
        kernel,
        out_shape=jax.ShapeDtypeStruct((B, out_dim), jnp.float32),
        grid=(n_tiles,),
        in_specs=in_specs,
        out_specs=pl.BlockSpec((B, tn), lambda j: (0, j)),
        scratch_shapes=[pltpu.VMEM((B, out_dim), cd)],     # resident h1
        compiler_params=pltpu.CompilerParams(
            dimension_semantics=("arbitrary",),            # h1 scratch carries across steps
            vmem_limit_bytes=VMEM_LIMIT),
        cost_estimate=cost,
    )(*args)


def prepare_params(params, in_dim, out_dim, compute_dtype=jnp.float32):
    """One-time parameter prep (do NOT call per forward): cast matmul weights to
    the compute dtype (bf16 recommended on v6e/v7x) and drop the Linear biases —
    training-mode BN subtracts the batch mean right after each Linear, so a
    per-feature bias cancels exactly.  Not valid for eval-mode/running-stats BN."""
    cd = jnp.dtype(compute_dtype)
    out = dict(w1=params["w1"].astype(cd), g1=params["g1"], be1=params["be1"],
               w2=params["w2"].astype(cd), g2=params["g2"], be2=params["be2"])
    if "ws" in params:
        out.update(ws=params["ws"].astype(cd), gs=params["gs"], bes=params["bes"])
    return out


def residual_block(x, p, in_dim, out_dim, *, mode="auto", max_tn=None):
    """ResidualBlock forward (training-mode BN), Pallas TPU.

    p: output of prepare_params().  x stays f32 inside the kernel (BN statistics,
    shortcut, and the residual add are always f32; only matmul operands use the
    compute dtype)."""
    B = x.shape[0]
    has_proj = "ws" in p
    assert has_proj == (in_dim != out_dim)
    cd = p["w1"].dtype
    isz = jnp.dtype(cd).itemsize
    x = x.astype(jnp.float32)

    w_bytes = (in_dim * out_dim * (2 if has_proj else 1) + out_dim * out_dim) * isz
    total_bytes = (B * in_dim * 4 + w_bytes + 8 * out_dim * 4
                   + B * out_dim * (isz + 8))

    if mode == "auto":
        mode = "fused" if (out_dim % 128 != 0 or total_bytes <= FUSED_VMEM_BUDGET) else "tiled"
    if mode == "tiled" and out_dim % 128 != 0:
        # TODO(synk): pad out_dim to a multiple of 128 for a lane-dense tiled path
        # instead of falling back to the fully-resident fused kernel.
        mode = "fused"

    if mode == "fused":
        return _fused_call(x, p, B, in_dim, out_dim, has_proj)
    tn = _pick_tile(B, in_dim, out_dim, isz, has_proj, max_tn)
    return _tiled_call(x, p, B, in_dim, out_dim, has_proj, tn)


# --------------------------------------------------------------------------- #
# Parameter init (PyTorch defaults) and pure-JAX reference
# --------------------------------------------------------------------------- #
def init_params(key, in_dim, out_dim):
    ks = jax.random.split(key, 6)

    def lin(kw, kb, fi, fo):
        bound = 1.0 / jnp.sqrt(jnp.float32(fi))
        w = jax.random.uniform(kw, (fi, fo), jnp.float32, -bound, bound)
        b = jax.random.uniform(kb, (1, fo), jnp.float32, -bound, bound)
        return w, b

    w1, b1 = lin(ks[0], ks[1], in_dim, out_dim)
    w2, b2 = lin(ks[2], ks[3], out_dim, out_dim)
    params = dict(
        w1=w1, b1=b1, g1=jnp.ones((1, out_dim), jnp.float32), be1=jnp.zeros((1, out_dim), jnp.float32),
        w2=w2, b2=b2, g2=jnp.ones((1, out_dim), jnp.float32), be2=jnp.zeros((1, out_dim), jnp.float32))
    if in_dim != out_dim:
        ws, bs = lin(ks[4], ks[5], in_dim, out_dim)
        params.update(ws=ws, bs=bs,
                      gs=jnp.ones((1, out_dim), jnp.float32),
                      bes=jnp.zeros((1, out_dim), jnp.float32))
    return params


def residual_block_ref(x, params, in_dim, out_dim):
    """Pure-JAX reference matching the PyTorch forward (training-mode BN, biases kept)."""
    hp = jax.lax.Precision.HIGHEST

    def lin(a, w, b):
        return jnp.dot(a, w, precision=hp) + b

    def bn(h, g, b):
        m = h.mean(0, keepdims=True)
        v = ((h - m) ** 2).mean(0, keepdims=True)
        return g * (h - m) / jnp.sqrt(v + EPS) + b

    if in_dim != out_dim:
        sc = bn(lin(x, params["ws"], params["bs"]), params["gs"], params["bes"])
    else:
        sc = x
    h1 = jnp.maximum(bn(lin(x, params["w1"], params["b1"]), params["g1"], params["be1"]), 0.0)
    h2 = bn(lin(h1, params["w2"], params["b2"]), params["g2"], params["be2"])
    return jnp.maximum(h2 + sc, 0.0)


# --------------------------------------------------------------------------- #
# Demo / self-test (small shapes)
# --------------------------------------------------------------------------- #
if __name__ == "__main__":
    # Tolerance note: in-kernel f32 matmuls use the MXU's default f32 path; the
    # reference uses Precision.HIGHEST, so allow a few 1e-3 of slack.
    key = jax.random.PRNGKey(0)
    ks = jax.random.split(key, 6)

    # --- A: tiny projection block (in=16, out=32) -> fused single-kernel path.
    B, I, O = 8, 16, 32
    x = jax.random.normal(ks[0], (B, I), jnp.float32)
    rawA = init_params(ks[1], I, O)
    pA = prepare_params(rawA, I, O)
    outA = jax.block_until_ready(residual_block(x, pA, I, O))
    refA = residual_block_ref(x, rawA, I, O)
    assert outA.shape == (B, O)
    assert jnp.allclose(outA, refA, atol=2e-2, rtol=2e-2), "fused proj mismatch"

    # --- B: projection shortcut, lane-aligned dims -> single tiled call, grid=(2,).
    B2, I2, O2 = 8, 64, 256
    x2 = jax.random.normal(ks[2], (B2, I2), jnp.float32)
    rawB = init_params(ks[3], I2, O2)
    pB = prepare_params(rawB, I2, O2)
    outB = jax.block_until_ready(residual_block(x2, pB, I2, O2, mode="tiled", max_tn=128))
    refB = residual_block_ref(x2, rawB, I2, O2)
    assert jnp.allclose(outB, refB, atol=2e-2, rtol=2e-2), "tiled proj mismatch"

    # --- C: identity shortcut, tiled path, grid=(2,).
    B3, D3 = 8, 256
    x3 = jax.random.normal(ks[4], (B3, D3), jnp.float32)
    rawC = init_params(ks[5], D3, D3)
    pC = prepare_params(rawC, D3, D3)
    outC = jax.block_until_ready(residual_block(x3, pC, D3, D3, mode="tiled", max_tn=128))
    refC = residual_block_ref(x3, rawC, D3, D3)
    assert jnp.allclose(outC, refC, atol=2e-2, rtol=2e-2), "tiled identity mismatch"

    # --- D: bf16 matmul operands (recommended on v6e/v7x); BN stats, shortcut and
    #        residual add stay f32, so only operand rounding shows up.
    pD = prepare_params(rawB, I2, O2, compute_dtype=jnp.bfloat16)
    outD = jax.block_until_ready(residual_block(x2, pD, I2, O2, mode="tiled", max_tn=128))
    assert jnp.allclose(outD, refB, atol=1.5e-1, rtol=1.5e-1), "bf16 tiled mismatch"

    print("KERNEL_OK")
</pallas_src>

<mosaic_0001>
module attributes {stable_mosaic.version = 11 : i64} {
  func.func @_fused_proj_kernel(%arg0: memref<8x16xf32, #tpu.memory_space<vmem>>, %arg1: memref<16x32xf32, #tpu.memory_space<vmem>>, %arg2: memref<1x32xf32, #tpu.memory_space<vmem>>, %arg3: memref<1x32xf32, #tpu.memory_space<vmem>>, %arg4: memref<16x32xf32, #tpu.memory_space<vmem>>, %arg5: memref<1x32xf32, #tpu.memory_space<vmem>>, %arg6: memref<1x32xf32, #tpu.memory_space<vmem>>, %arg7: memref<32x32xf32, #tpu.memory_space<vmem>>, %arg8: memref<1x32xf32, #tpu.memory_space<vmem>>, %arg9: memref<1x32xf32, #tpu.memory_space<vmem>>, %arg10: memref<8x32xf32, #tpu.memory_space<vmem>>) attributes {dimension_semantics = [], scalar_prefetch = 0 : i64, scratch_operands = 0 : i64, tpu.core_type = #tpu.core_type<tc>} {
    %c0 = arith.constant 0 : index
    %c0_0 = arith.constant 0 : index
    %0 = vector.load %arg0[%c0, %c0_0] : memref<8x16xf32, #tpu.memory_space<vmem>>, vector<8x16xf32>
    %c0_1 = arith.constant 0 : index
    %c0_2 = arith.constant 0 : index
    %1 = vector.load %arg1[%c0_1, %c0_2] : memref<16x32xf32, #tpu.memory_space<vmem>>, vector<16x32xf32>
    %cst = arith.constant dense<0.000000e+00> : vector<8x32xf32>
    %2 = tpu.matmul %0, %1, %cst {dimension_numbers = #tpu.dot_dimension_numbers<[1], [0], [0], [1], [0, 0, 1, 1], [], []>} : vector<8x16xf32>, vector<16x32xf32>, vector<8x32xf32> -> vector<8x32xf32>
    %c0_3 = arith.constant 0 : index
    %c0_4 = arith.constant 0 : index
    %3 = vector.load %arg2[%c0_3, %c0_4] : memref<1x32xf32, #tpu.memory_space<vmem>>, vector<1x32xf32>
    %c0_5 = arith.constant 0 : index
    %c0_6 = arith.constant 0 : index
    %4 = vector.load %arg3[%c0_5, %c0_6] : memref<1x32xf32, #tpu.memory_space<vmem>>, vector<1x32xf32>
    %cst_7 = arith.constant dense<0.000000e+00> : vector<32xf32>
    %5 = vector.multi_reduction <add>, %2, %cst_7 [0] : vector<8x32xf32> to vector<32xf32>
    %6 = vector.shape_cast %5 : vector<32xf32> to vector<1x32xf32>
    %cst_8 = arith.constant 8.000000e+00 : f32
    %7 = vector.broadcast %cst_8 : f32 to vector<1x32xf32>
    %8 = arith.divf %6, %7 : vector<1x32xf32>
    %9 = vector.broadcast %8 : vector<1x32xf32> to vector<8x32xf32>
    %10 = arith.subf %2, %9 : vector<8x32xf32>
    %11 = arith.mulf %10, %10 : vector<8x32xf32>
    %cst_9 = arith.constant dense<0.000000e+00> : vector<32xf32>
    %12 = vector.multi_reduction <add>, %11, %cst_9 [0] : vector<8x32xf32> to vector<32xf32>
    %13 = vector.shape_cast %12 : vector<32xf32> to vector<1x32xf32>
    %cst_10 = arith.constant 8.000000e+00 : f32
    %14 = vector.broadcast %cst_10 : f32 to vector<1x32xf32>
    %15 = arith.divf %13, %14 : vector<1x32xf32>
    %cst_11 = arith.constant 9.99999974E-6 : f32
    %16 = vector.broadcast %cst_11 : f32 to vector<1x32xf32>
    %17 = arith.addf %15, %16 : vector<1x32xf32>
    %18 = math.rsqrt %17 : vector<1x32xf32>
    %19 = arith.mulf %3, %18 : vector<1x32xf32>
    %20 = vector.broadcast %19 : vector<1x32xf32> to vector<8x32xf32>
    %21 = arith.mulf %10, %20 : vector<8x32xf32>
    %22 = vector.broadcast %4 : vector<1x32xf32> to vector<8x32xf32>
    %23 = arith.addf %21, %22 : vector<8x32xf32>
    %cst_12 = arith.constant 0.000000e+00 : f32
    %24 = vector.broadcast %cst_12 : f32 to vector<8x32xf32>
    %25 = arith.maximumf %23, %24 : vector<8x32xf32>
    %c0_13 = arith.constant 0 : index
    %c0_14 = arith.constant 0 : index
    %26 = vector.load %arg4[%c0_13, %c0_14] : memref<16x32xf32, #tpu.memory_space<vmem>>, vector<16x32xf32>
    %cst_15 = arith.constant dense<0.000000e+00> : vector<8x32xf32>
    %27 = tpu.matmul %0, %26, %cst_15 {dimension_numbers = #tpu.dot_dimension_numbers<[1], [0], [0], [1], [0, 0, 1, 1], [], []>} : vector<8x16xf32>, vector<16x32xf32>, vector<8x32xf32> -> vector<8x32xf32>
    %c0_16 = arith.constant 0 : index
    %c0_17 = arith.constant 0 : index
    %28 = vector.load %arg5[%c0_16, %c0_17] : memref<1x32xf32, #tpu.memory_space<vmem>>, vector<1x32xf32>
    %c0_18 = arith.constant 0 : index
    %c0_19 = arith.constant 0 : index
    %29 = vector.load %arg6[%c0_18, %c0_19] : memref<1x32xf32, #tpu.memory_space<vmem>>, vector<1x32xf32>
    %cst_20 = arith.constant dense<0.000000e+00> : vector<32xf32>
    %30 = vector.multi_reduction <add>, %27, %cst_20 [0] : vector<8x32xf32> to vector<32xf32>
    %31 = vector.shape_cast %30 : vector<32xf32> to vector<1x32xf32>
    %cst_21 = arith.constant 8.000000e+00 : f32
    %32 = vector.broadcast %cst_21 : f32 to vector<1x32xf32>
    %33 = arith.divf %31, %32 : vector<1x32xf32>
    %34 = vector.broadcast %33 : vector<1x32xf32> to vector<8x32xf32>
    %35 = arith.subf %27, %34 : vector<8x32xf32>
    %36 = arith.mulf %35, %35 : vector<8x32xf32>
    %cst_22 = arith.constant dense<0.000000e+00> : vector<32xf32>
    %37 = vector.multi_reduction <add>, %36, %cst_22 [0] : vector<8x32xf32> to vector<32xf32>
    %38 = vector.shape_cast %37 : vector<32xf32> to vector<1x32xf32>
    %cst_23 = arith.constant 8.000000e+00 : f32
    %39 = vector.broadcast %cst_23 : f32 to vector<1x32xf32>
    %40 = arith.divf %38, %39 : vector<1x32xf32>
    %cst_24 = arith.constant 9.99999974E-6 : f32
    %41 = vector.broadcast %cst_24 : f32 to vector<1x32xf32>
    %42 = arith.addf %40, %41 : vector<1x32xf32>
    %43 = math.rsqrt %42 : vector<1x32xf32>
    %44 = arith.mulf %28, %43 : vector<1x32xf32>
    %45 = vector.broadcast %44 : vector<1x32xf32> to vector<8x32xf32>
    %46 = arith.mulf %35, %45 : vector<8x32xf32>
    %47 = vector.broadcast %29 : vector<1x32xf32> to vector<8x32xf32>
    %48 = arith.addf %46, %47 : vector<8x32xf32>
    %c0_25 = arith.constant 0 : index
    %c0_26 = arith.constant 0 : index
    %49 = vector.load %arg7[%c0_25, %c0_26] : memref<32x32xf32, #tpu.memory_space<vmem>>, vector<32x32xf32>
    %cst_27 = arith.constant dense<0.000000e+00> : vector<8x32xf32>
    %50 = tpu.matmul %25, %49, %cst_27 {dimension_numbers = #tpu.dot_dimension_numbers<[1], [0], [0], [1], [0, 0, 1, 1], [], []>} : vector<8x32xf32>, vector<32x32xf32>, vector<8x32xf32> -> vector<8x32xf32>
    %c0_28 = arith.constant 0 : index
    %c0_29 = arith.constant 0 : index
    %51 = vector.load %arg8[%c0_28, %c0_29] : memref<1x32xf32, #tpu.memory_space<vmem>>, vector<1x32xf32>
    %c0_30 = arith.constant 0 : index
    %c0_31 = arith.constant 0 : index
    %52 = vector.load %arg9[%c0_30, %c0_31] : memref<1x32xf32, #tpu.memory_space<vmem>>, vector<1x32xf32>
    %cst_32 = arith.constant dense<0.000000e+00> : vector<32xf32>
    %53 = vector.multi_reduction <add>, %50, %cst_32 [0] : vector<8x32xf32> to vector<32xf32>
    %54 = vector.shape_cast %53 : vector<32xf32> to vector<1x32xf32>
    %cst_33 = arith.constant 8.000000e+00 : f32
    %55 = vector.broadcast %cst_33 : f32 to vector<1x32xf32>
    %56 = arith.divf %54, %55 : vector<1x32xf32>
    %57 = vector.broadcast %56 : vector<1x32xf32> to vector<8x32xf32>
    %58 = arith.subf %50, %57 : vector<8x32xf32>
    %59 = arith.mulf %58, %58 : vector<8x32xf32>
    %cst_34 = arith.constant dense<0.000000e+00> : vector<32xf32>
    %60 = vector.multi_reduction <add>, %59, %cst_34 [0] : vector<8x32xf32> to vector<32xf32>
    %61 = vector.shape_cast %60 : vector<32xf32> to vector<1x32xf32>
    %cst_35 = arith.constant 8.000000e+00 : f32
    %62 = vector.broadcast %cst_35 : f32 to vector<1x32xf32>
    %63 = arith.divf %61, %62 : vector<1x32xf32>
    %cst_36 = arith.constant 9.99999974E-6 : f32
    %64 = vector.broadcast %cst_36 : f32 to vector<1x32xf32>
    %65 = arith.addf %63, %64 : vector<1x32xf32>
    %66 = math.rsqrt %65 : vector<1x32xf32>
    %67 = arith.mulf %51, %66 : vector<1x32xf32>
    %68 = vector.broadcast %67 : vector<1x32xf32> to vector<8x32xf32>
    %69 = arith.mulf %58, %68 : vector<8x32xf32>
    %70 = vector.broadcast %52 : vector<1x32xf32> to vector<8x32xf32>
    %71 = arith.addf %69, %70 : vector<8x32xf32>
    %72 = arith.addf %71, %48 : vector<8x32xf32>
    %cst_37 = arith.constant 0.000000e+00 : f32
    %73 = vector.broadcast %cst_37 : f32 to vector<8x32xf32>
    %74 = arith.maximumf %72, %73 : vector<8x32xf32>
    %c0_38 = arith.constant 0 : index
    %c0_39 = arith.constant 0 : index
    %75 = vector.load %arg10[%c0_38, %c0_39] : memref<8x32xf32, #tpu.memory_space<vmem>>, vector<8x32xf32>
    tpu.vector_store %arg10[%c0_38, %c0_39], %74 {strides = array<i32>} : memref<8x32xf32, #tpu.memory_space<vmem>>, vector<8x32xf32>,
    return
  }
}

</mosaic_0001>

<bundles_post_ra>
// kernel: tpu_custom_call.1
= control target key start
LH: loop header
LB: loop body
LE: loop exit
PB: predicated region body
PF: predicated region fallthrough
CT: control target
= control target key end

     0   :  { %15 = vsyncpa [#allocation3], 0  ;;  %s1078_s0 = inlined_call_operand.hbm [shape: f32[8,16], index: 0, kind: input, shape index: {}]   ;;  %s1079_s1 = inlined_call_operand.hbm [shape: f32[16,32], index: 1, kind: input, shape index: {}]   ;;  %s1080_s2 = inlined_call_operand.hbm [shape: f32[1,32], index: 2, kind: input, shape index: {}]   ;;  %s1081_s3 = inlined_call_operand.hbm [shape: f32[1,32], index: 3, kind: input, shape index: {}]   ;;  %s1082_s4 = inlined_call_operand.hbm [shape: f32[16,32], index: 4, kind: input, shape index: {}]   ;;  %s1083_s5 = inlined_call_operand.hbm [shape: f32[1,32], index: 5, kind: input, shape index: {}]   ;;  %s1084_s6 = inlined_call_operand.hbm [shape: f32[1,32], index: 6, kind: input, shape index: {}]   ;;  %s1085_s7 = inlined_call_operand.hbm [shape: f32[32,32], index: 7, kind: input, shape index: {}]   ;;  %s1086_s8 = inlined_call_operand.hbm [shape: f32[1,32], index: 8, kind: input, shape index: {}]   ;;  %s1087_s9 = inlined_call_operand.hbm [shape: f32[1,32], index: 9, kind: input, shape index: {}]   ;;  %s1088_s10 = inlined_call_operand.hbm [shape: f32[8,32], index: 10, kind: output, shape index: {}]  }
   0x1   :  { %16 = vsyncpa [#allocation6], 0 }
   0x2   :  { %17 = vsyncpa [#allocation9], 0 }
   0x3   :  { %18 = vsyncpa [#allocation12], 0 }
   0x4   :  { %19 = vsyncpa [#allocation15], 0 }
   0x5   :  { %20 = vsyncpa [#allocation18], 0 }
   0x6   :  { %21 = vsyncpa [#allocation4], 0  ;;  %s853_s13 = smov [#allocation5]   ;;  %s597_s17 = scalar_lea.hbm %s1079_s1, 256 }
   0x7   :  { %s37_s14 = sshll.u32 %s853_s13, 4  ;;  %p598_p0 = scmp.ne.s32.totalorder %s1079_s1, %s597_s17  ;;  %s38_s14 = int_to_ptr.vmem [resolvable:$true] %s37_s14 }
   0x8   :  { %p601_p1 = scmp.lt.u32.totalorder %s597_s17, %s1079_s1 }
   0xa   :  { %p603_p2 = pnand %p601_p1, %p598_p0 }
   0xc   :  { %606 = shalt.err (!%p603_p2)
}
   0xd   :  { %s607_s22 = scalar_lea.vmem %s38_s14, 256  ;;  %p612_p4 = scmp.lt.s32.totalorder %s38_s14, %s38_s14 }
   0xe   :  { %p608_p3 = scmp.ne.s32.totalorder %s38_s14, %s607_s22  ;;  %p613_p5 = scmp.lt.s32.totalorder %s607_s22, %s607_s22 }
  0x10   :  { %p614_p6 = por %p613_p5, %p612_p4 }
  0x12   :  { %p615_p7 = pnand %p614_p6, %p608_p3 }
  0x14   :  { %618 = shalt.err (!%p615_p7)
}
  0x15   :  { %s854_s23 = smov 128   ;;  %s855_s24 = smov 8  }
  0x16   :  { %43 = dma.hbm_to_vmem [thread:$0]  %s1079_s1, 256, %s38_s14, [#allocation6], %s854_s23, %s854_s23, %s855_s24  }
  0x17   :  { %s856_s27 = smov [#allocation8]   ;;  %s857_s29 = smov [#allocation11]  }
  0x18   :  { %s60_s28 = sshll.u32 %s856_s27, 4  ;;  %s82_s30 = sshll.u32 %s857_s29, 4  ;;  %s61_s28 = int_to_ptr.vmem [resolvable:$true] %s60_s28  ;;  %s83_s30 = int_to_ptr.vmem [resolvable:$true] %s82_s30 }
  0x19   :  { %s619_s13 = scalar_lea.hbm %s1081_s3, 16 }
  0x1a   :  { %p620_p8 = scmp.ne.s32.totalorder %s1081_s3, %s619_s13  ;;  %p623_p9 = scmp.lt.u32.totalorder %s619_s13, %s1081_s3 }
  0x1c   :  { %p625_p10 = pnand %p623_p9, %p620_p8 }
  0x1e   :  { %628 = shalt.err (!%p625_p10)
}
  0x1f   :  { %s629_s1 = scalar_lea.vmem %s61_s28, 16  ;;  %s633_s14 = scalar_lea.vmem %s61_s28, 32 }
  0x20   :  { %p630_p11 = scmp.ne.s32.totalorder %s61_s28, %s629_s1  ;;  %p634_p12 = scmp.lt.s32.totalorder %s61_s28, %s61_s28 }
  0x21   :  { %p635_p13 = scmp.lt.s32.totalorder %s633_s14, %s629_s1 }
  0x23   :  { %p636_p0 = por %p635_p13, %p634_p12 }
  0x25   :  { %p637_p1 = pnand %p636_p0, %p630_p11 }
  0x27   :  { %640 = shalt.err (!%p637_p1)
}
  0x28   :  { %63 = dma.hbm_to_vmem [thread:$0]  %s1081_s3, 16, %s61_s28, [#allocation9]  }
  0x29   :  { %s641_s25 = scalar_lea.hbm %s1083_s5, 16 }
  0x2a   :  { %p642_p2 = scmp.ne.s32.totalorder %s1083_s5, %s641_s25  ;;  %p645_p3 = scmp.lt.u32.totalorder %s641_s25, %s1083_s5 }
  0x2c   :  { %p647_p4 = pnand %p645_p3, %p642_p2 }
  0x2e   :  { %650 = shalt.err (!%p647_p4)
}
  0x2f   :  { %s651_s12 = scalar_lea.vmem %s83_s30, 16  ;;  %s655_s13 = scalar_lea.vmem %s83_s30, 32 }
  0x30   :  { %p652_p5 = scmp.ne.s32.totalorder %s83_s30, %s651_s12  ;;  %p656_p6 = scmp.lt.s32.totalorder %s83_s30, %s83_s30 }
  0x31   :  { %p657_p7 = scmp.lt.s32.totalorder %s655_s13, %s651_s12 }
  0x33   :  { %p658_p8 = por %p657_p7, %p656_p6 }
  0x35   :  { %p659_p9 = pnand %p658_p8, %p652_p5 }
  0x37   :  { %662 = shalt.err (!%p659_p9)
}
  0x38   :  { %85 = dma.hbm_to_vmem [thread:$0]  %s1083_s5, 16, %s83_s30, [#allocation12]  }
  0x39   :  { %s858_s15 = smov [#allocation14]   ;;  %s859_s17 = smov [#allocation2]  }
  0x3a   :  { %s101_s16 = sshll.u32 %s858_s15, 4  ;;  %s28_s18 = sshll.u32 %s859_s17, 4  ;;  %s102_s16 = int_to_ptr.vmem [resolvable:$true] %s101_s16  ;;  %s29_s18 = int_to_ptr.vmem [resolvable:$true] %s28_s18 }
  0x3b   :  { %s663_s19 = scalar_lea.hbm %s1085_s7, 512 }
  0x3c   :  { %p664_p10 = scmp.ne.s32.totalorder %s1085_s7, %s663_s19  ;;  %p667_p11 = scmp.lt.u32.totalorder %s663_s19, %s1085_s7 }
  0x3e   :  { %p669_p12 = pnand %p667_p11, %p664_p10 }
  0x40   :  { %672 = shalt.err (!%p669_p12)
}
  0x41   :  { %s673_s5 = scalar_lea.vmem %s102_s16, 512  ;;  %p678_p0 = scmp.lt.s32.totalorder %s102_s16, %s102_s16 }
  0x42   :  { %p674_p13 = scmp.ne.s32.totalorder %s102_s16, %s673_s5  ;;  %p679_p1 = scmp.lt.s32.totalorder %s673_s5, %s673_s5 }
  0x44   :  { %p680_p2 = por %p679_p1, %p678_p0 }
  0x46   :  { %p681_p3 = pnand %p680_p2, %p674_p13 }
  0x48   :  { %684 = shalt.err (!%p681_p3)
}
  0x49   :  { %107 = dma.hbm_to_vmem [thread:$0]  %s1085_s7, 512, %s102_s16, [#allocation15], %s854_s23, %s854_s23, %s855_s24  }
  0x4a   :  { %s685_s11 = scalar_lea.hbm %s1078_s0, 128 }
  0x4b   :  { %p686_p4 = scmp.ne.s32.totalorder %s1078_s0, %s685_s11  ;;  %p689_p5 = scmp.lt.u32.totalorder %s685_s11, %s1078_s0 }
  0x4d   :  { %p691_p6 = pnand %p689_p5, %p686_p4 }
  0x4f   :  { %694 = shalt.err (!%p691_p6)
}
  0x50   :  { %s695_s15 = scalar_lea.vmem %s29_s18, 128  ;;  %p700_p8 = scmp.lt.s32.totalorder %s29_s18, %s29_s18 }
  0x51   :  { %p696_p7 = scmp.ne.s32.totalorder %s29_s18, %s695_s15  ;;  %p701_p9 = scmp.lt.s32.totalorder %s695_s15, %s695_s15 }
  0x53   :  { %p702_p10 = por %p701_p9, %p700_p8 }
  0x55   :  { %p703_p11 = pnand %p702_p10, %p696_p7 }
  0x57   :  { %706 = shalt.err (!%p703_p11)
}
  0x58   :  { %31 = dma.hbm_to_vmem [thread:$0]  %s1078_s0, 128, %s29_s18, [#allocation3]  }
  0x59   :  { %s860_s17 = smov [#allocation7]   ;;  %s861_s14 = smov [#allocation10]  }
  0x5a   :  { %s50_s1 = sshll.u32 %s860_s17, 4  ;;  %s69_s19 = sshll.u32 %s861_s14, 4  ;;  %s51_s1 = int_to_ptr.vmem [resolvable:$true] %s50_s1  ;;  %s70_s19 = int_to_ptr.vmem [resolvable:$true] %s69_s19 }
  0x5b   :  { %s707_s22 = scalar_lea.hbm %s1080_s2, 16 }
  0x5c   :  { %p708_p12 = scmp.ne.s32.totalorder %s1080_s2, %s707_s22  ;;  %p711_p13 = scmp.lt.u32.totalorder %s707_s22, %s1080_s2 }
  0x5e   :  { %p713_p0 = pnand %p711_p13, %p708_p12 }
  0x60   :  { %716 = shalt.err (!%p713_p0)
}
  0x61   :  { %s717_s0 = scalar_lea.vmem %s51_s1, 16  ;;  %s721_s18 = scalar_lea.vmem %s51_s1, 32 }
  0x62   :  { %p718_p1 = scmp.ne.s32.totalorder %s51_s1, %s717_s0  ;;  %p722_p2 = scmp.lt.s32.totalorder %s51_s1, %s51_s1 }
  0x63   :  { %p723_p3 = scmp.lt.s32.totalorder %s721_s18, %s717_s0 }
  0x65   :  { %p724_p4 = por %p723_p3, %p722_p2 }
  0x67   :  { %p725_p5 = pnand %p724_p4, %p718_p1 }
  0x69   :  { %728 = shalt.err (!%p725_p5)
}
  0x6a   :  { %53 = dma.hbm_to_vmem [thread:$0]  %s1080_s2, 16, %s51_s1, [#allocation6]  }
  0x6b   :  { %s729_s13 = scalar_lea.hbm %s1082_s4, 256 }
  0x6c   :  { %p730_p6 = scmp.ne.s32.totalorder %s1082_s4, %s729_s13  ;;  %p733_p7 = scmp.lt.u32.totalorder %s729_s13, %s1082_s4 }
  0x6e   :  { %p735_p8 = pnand %p733_p7, %p730_p6 }
  0x70   :  { %738 = shalt.err (!%p735_p8)
}
  0x71   :  { %s739_s16 = scalar_lea.vmem %s70_s19, 256  ;;  %p744_p10 = scmp.lt.s32.totalorder %s70_s19, %s70_s19 }
  0x72   :  { %p740_p9 = scmp.ne.s32.totalorder %s70_s19, %s739_s16  ;;  %p745_p11 = scmp.lt.s32.totalorder %s739_s16, %s739_s16 }
  0x74   :  { %p746_p12 = por %p745_p11, %p744_p10 }
  0x76   :  { %p747_p13 = pnand %p746_p12, %p740_p9 }
  0x78   :  { %750 = shalt.err (!%p747_p13)
}
  0x79   :  { %75 = dma.hbm_to_vmem [thread:$0]  %s1082_s4, 256, %s70_s19, [#allocation9], %s854_s23, %s854_s23, %s855_s24  }
  0x7a   :  { %s862_s1 = smov [#allocation13]   ;;  %s863_s20 = smov [#allocation16]  }
  0x7b   :  { %s92_s14 = sshll.u32 %s862_s1, 4  ;;  %s114_s21 = sshll.u32 %s863_s20, 4  ;;  %s93_s14 = int_to_ptr.vmem [resolvable:$true] %s92_s14  ;;  %s115_s21 = int_to_ptr.vmem [resolvable:$true] %s114_s21 }
  0x7c   :  { %s751_s5 = scalar_lea.hbm %s1084_s6, 16 }
  0x7d   :  { %p752_p0 = scmp.ne.s32.totalorder %s1084_s6, %s751_s5  ;;  %p755_p1 = scmp.lt.u32.totalorder %s751_s5, %s1084_s6 }
  0x7f   :  { %p757_p2 = pnand %p755_p1, %p752_p0 }
  0x81   :  { %760 = shalt.err (!%p757_p2)
}
  0x82   :  { %s761_s4 = scalar_lea.vmem %s93_s14, 16  ;;  %s765_s23 = scalar_lea.vmem %s93_s14, 32 }
  0x83   :  { %p762_p3 = scmp.ne.s32.totalorder %s93_s14, %s761_s4  ;;  %p766_p4 = scmp.lt.s32.totalorder %s93_s14, %s93_s14 }
  0x84   :  { %p767_p5 = scmp.lt.s32.totalorder %s765_s23, %s761_s4 }
  0x86   :  { %p768_p6 = por %p767_p5, %p766_p4 }
  0x88   :  { %p769_p7 = pnand %p768_p6, %p762_p3 }
  0x8a   :  { %772 = shalt.err (!%p769_p7)
}
  0x8b   :  { %95 = dma.hbm_to_vmem [thread:$0]  %s1084_s6, 16, %s93_s14, [#allocation12]  }
  0x8c   :  { %s773_s11 = scalar_lea.hbm %s1086_s8, 16 }
  0x8d   :  { %p774_p8 = scmp.ne.s32.totalorder %s1086_s8, %s773_s11  ;;  %p777_p9 = scmp.lt.u32.totalorder %s773_s11, %s1086_s8 }
  0x8f   :  { %p779_p10 = pnand %p777_p9, %p774_p8 }
  0x91   :  { %782 = shalt.err (!%p779_p10)
}
  0x92   :  { %s783_s15 = scalar_lea.vmem %s115_s21, 16  ;;  %s787_s7 = scalar_lea.vmem %s115_s21, 32 }
  0x93   :  { %p784_p11 = scmp.ne.s32.totalorder %s115_s21, %s783_s15  ;;  %p788_p12 = scmp.lt.s32.totalorder %s115_s21, %s115_s21 }
  0x94   :  { %p789_p13 = scmp.lt.s32.totalorder %s787_s7, %s783_s15 }
  0x96   :  { %p790_p0 = por %p789_p13, %p788_p12 }
  0x98   :  { %p791_p1 = pnand %p790_p0, %p784_p11 }
  0x9a   :  { %794 = shalt.err (!%p791_p1)
}
  0x9b   :  { %117 = dma.hbm_to_vmem [thread:$0]  %s1086_s8, 16, %s115_s21, [#allocation15]  }
  0x9c   :  { %s864_s2 = smov [#allocation17]   ;;  %s795_s20 = scalar_lea.hbm %s1087_s9, 16 }
  0x9d   :  { %s124_s17 = sshll.u32 %s864_s2, 4  ;;  %p796_p2 = scmp.ne.s32.totalorder %s1087_s9, %s795_s20  ;;  %s125_s17 = int_to_ptr.vmem [resolvable:$true] %s124_s17 }
  0x9e   :  { %p799_p3 = scmp.lt.u32.totalorder %s795_s20, %s1087_s9 }
  0xa0   :  { %p801_p4 = pnand %p799_p3, %p796_p2 }
  0xa2   :  { %804 = shalt.err (!%p801_p4)
}
  0xa3   :  { %s805_s26 = scalar_lea.vmem %s125_s17, 16  ;;  %s809_s8 = scalar_lea.vmem %s125_s17, 32 }
  0xa4   :  { %p806_p5 = scmp.ne.s32.totalorder %s125_s17, %s805_s26  ;;  %p810_p6 = scmp.lt.s32.totalorder %s125_s17, %s125_s17 }
  0xa5   :  { %p811_p7 = scmp.lt.s32.totalorder %s809_s8, %s805_s26 }
  0xa7   :  { %p812_p8 = por %p811_p7, %p810_p6 }
  0xa9   :  { %p813_p9 = pnand %p812_p8, %p806_p5 }
  0xab   :  { %816 = shalt.err (!%p813_p9)
}
  0xac   :  { %127 = dma.hbm_to_vmem [thread:$0]  %s1087_s9, 16, %s125_s17, [#allocation18]  }
  0xad   :  { %839 = dma.done.wait [#allocation3], 128  }
  0xae   :  { %840 = vsyncadd [#allocation3], 4294967168 }
  0xaf   :  { %841 = dma.done.wait [#allocation6], 272  }
  0xb0   :  { %842 = vsyncadd [#allocation6], 4294967024 }
  0xb1   :  { %843 = dma.done.wait [#allocation9], 272  }
  0xb2   :  { %844 = vsyncadd [#allocation9], 4294967024 }
  0xb3   :  { %845 = dma.done.wait [#allocation12], 32  }
  0xb4   :  { %846 = vsyncadd [#allocation12], 4294967264 }
  0xb5   :  { %847 = dma.done.wait [#allocation15], 528  }
  0xb6   :  { %848 = vsyncadd [#allocation15], 4294966768 }
  0xb7   :  { %849 = dma.done.wait [#allocation18], 16  }
  0xb8   :  { %850 = vsyncadd [#allocation18], 4294967280  ;;  %v865_v0 = vmov 0.0|0.0   ;;  %vm866_vm0 = vmmov 0   ;;  %v867_v1 = vmov 0.0   ;;  %v159_v2 = vld [vmem:[#allocation5] sm:$0xff]  ;;  %v261_v36 = vlaneseq }
  0xb9   :  { %563 = vmatprep.subr.bf16.mxu1 %v865_v0  ;;  %542 = vmatprep.mubr.msk.f32.mxu1 %vm866_vm0, %v867_v1  ;;  %v160_v3 = vld [vmem:[#allocation5 + $0x8] sm:$0xff]  ;;  %v158_v5 = vld [vmem:[#allocation2] sm:$0xff]  ;;  %vm161_vm1 = vcmask 130048   ;;  %v385_v10 = vld [vmem:[#allocation14 + $0x8] sm:$0xff]  ;;  %vm237_vm2 = vcmask 261120   ;;  %s868_s9 = smov [#allocation19]  }
  0xba   :  { %569 = vmatprep.subr.bf16.mxu0 %v865_v0  ;;  %560 = vmatprep.mubr.msk.f32.mxu0 %vm866_vm0, %v867_v1  ;;  %v564_v4 = vpack.c.bf16 %v160_v3, %v159_v2  ;;  %v275_v6 = vld [vmem:[#allocation10] sm:$0xff]  ;;  %v276_v7 = vld [vmem:[#allocation10 + $0x8] sm:$0xff]  ;;  %v384_v9 = vld [vmem:[#allocation14] sm:$0xff]  ;;  %v262_v37 = vshrl.u32 %v261_v36, 7  ;;  %s507_s18 = sshll.u32 %s868_s9, 4  ;;  %s508_s18 = int_to_ptr.vmem [resolvable:$true] %s507_s18 }
  0xbb   :  { %v567_v8 = vpack.c.bf16 %v276_v7, %v275_v6  ;;  %v570_v11 = vpack.c.bf16 %v385_v10, %v384_v9  ;;  %v386_v12 = vld [vmem:[#allocation14 + $0x10] sm:$0xff]  ;;  %v387_v13 = vld [vmem:[#allocation14 + $0x18] sm:$0xff]  ;;  %v235_v38 = vld [vmem:[#allocation7] sm:$0x1]  ;;  %s817_s4 = scalar_lea.vmem %s508_s18, 128  ;;  %p822_p11 = scmp.lt.s32.totalorder %s508_s18, %s508_s18 }
  0xbc   :  { %565 = vmatpush3.bf16.msra.mxu1 %v564_v4  ;;  %v573_v14 = vpack.c.bf16 %v387_v13, %v386_v12  ;;  %v1055_v39 = vsub.s32 0, %v262_v37  ;;  %v522_v43 = vld [vmem:[#allocation8] ss:$0 sm:$0xff]  ;;  %p818_p10 = scmp.ne.s32.totalorder %s508_s18, %s817_s4  ;;  %p823_p12 = scmp.lt.s32.totalorder %s817_s4, %s817_s4 }
  0xbd   :  { %566 = vmatprep.subr.bf16.mxu1 %v865_v0  ;;  %571 = vmatpush3.bf16.msra.mxu0 %v570_v11 }
  0xbe   :  { %572 = vmatprep.subr.bf16.mxu0 %v865_v0  ;;  %p824_p13 = por %p823_p12, %p822_p11 }
  0xbf   :  { %543 = vmatmul.mubr.msk.f32.vlgmr.msra.gmra.mrb[0].mxu1 %vm161_vm1, %v158_v5 }
  0xc0   :  { %549 = vmatprep.mubr.msk.f32.mxu1 %vm866_vm0, %v867_v1  ;;  %568 = vmatpush3.bf16.msra.mxu1 %v567_v8  ;;  %p825_p0 = pnand %p824_p13, %p818_p10 }
  0xc1   :  { %574 = vmatpush3.bf16.msra.mxu0 %v573_v14 }
  0xc3   :  { %550 = vmatmul.mubr.msk.f32.vlgmr.msra.gmra.mrb[2].mxu1 %vm161_vm1, %v158_v5 }
 0x192   :  { %v231_v15 = vpop.f32.mrb[0].mxu1 }
 0x193   :  { %v238_v16 = vsel %vm237_vm2, %v231_v15, 0.0  ;;  %v544_v17 = vpop.f32.mrb[1].mxu1 }
 0x194   :  { %v239_v18 = vrot.slane %v238_v16, 4 }
 0x196   :  { %v240_v19 = vadd.f32 %v239_v18, %v238_v16  ;;  %v343_v47 = vpop.f32.mrb[2].mxu1 }
 0x197   :  { %v551_v48 = vpop.f32.mrb[3].mxu1  ;;  %v349_v49 = vsel %vm237_vm2, %v343_v47, 0.0 }
 0x198   :  { %v241_v20 = vrot.slane %v240_v19, 2  ;;  %v350_v50 = vrot.slane %v349_v49, 4 }
 0x19a   :  { %v242_v21 = vadd.f32 %v241_v20, %v240_v19  ;;  %v351_v51 = vadd.f32 %v350_v50, %v349_v49 }
 0x19c   :  { %v243_v22 = vrot.slane %v242_v21, 1  ;;  %v352_v52 = vrot.slane %v351_v51, 2 }
 0x19e   :  { %v244_v23 = vadd.f32 %v243_v22, %v242_v21  ;;  %v353_v53 = vadd.f32 %v352_v52, %v351_v51 }
 0x1a0   :  { %v246_v24 = vmul.f32 0.125, %v244_v23  ;;  %v354_v54 = vrot.slane %v353_v53, 1 }
 0x1a2   :  { %v247_v25 = vsub.f32 %v231_v15, %v246_v24  ;;  %v355_v55 = vadd.f32 %v354_v54, %v353_v53 }
 0x1a4   :  { %v248_v26 = vmul.f32 %v247_v25, %v247_v25  ;;  %v356_v56 = vmul.f32 0.125, %v355_v55 }
 0x1a6   :  { %v249_v27 = vsel %vm237_vm2, %v248_v26, 0.0  ;;  %v357_v57 = vsub.f32 %v343_v47, %v356_v56  ;;  %v347_v26 = vld [vmem:[#allocation11] sm:$0x1] }
 0x1a7   :  { %v250_v28 = vrot.slane %v249_v27, 4 }
 0x1a8   :  { %v358_v58 = vmul.f32 %v357_v57, %v357_v57 }
 0x1a9   :  { %v251_v29 = vadd.f32 %v250_v28, %v249_v27  ;;  %v461_v28 = vld [vmem:[#allocation16] sm:$0x1] }
 0x1aa   :  { %v359_v59 = vsel %vm237_vm2, %v358_v58, 0.0 }
 0x1ab   :  { %v252_v30 = vrot.slane %v251_v29, 2  ;;  %v360_v60 = vrot.slane %v359_v59, 4 }
 0x1ad   :  { %v253_v31 = vadd.f32 %v252_v30, %v251_v29  ;;  %v361_v62 = vadd.f32 %v360_v60, %v359_v59 }
 0x1af   :  { %v254_v32 = vrot.slane %v253_v31, 1  ;;  %v362_v3 = vrot.slane %v361_v62, 2 }
 0x1b1   :  { %v255_v33 = vadd.f32 %v254_v32, %v253_v31  ;;  %v363_v6 = vadd.f32 %v362_v3, %v361_v62 }
 0x1b3   :  { %v256_v34 = vmul.f32 0.125, %v255_v33  ;;  %v364_v9 = vrot.slane %v363_v6, 1 }
 0x1b5   :  { %v257_v35 = vadd.f32 1e-05, %v256_v34  ;;  %v365_v12 = vadd.f32 %v364_v9, %v363_v6  ;;  %v524_v34 = vld [vmem:[#allocation13] ss:$0 sm:$0xff] }
 0x1b7   :  { %591 = vrsqrt.f32 %v257_v35  ;;  %v366_v15 = vmul.f32 0.125, %v365_v12  ;;  %v526_v35 = vld [vmem:[#allocation17] ss:$0 sm:$0xff] }
 0x1b9   :  { %v367_v18 = vadd.f32 1e-05, %v366_v15 }
 0x1bb   :  { %593 = vrsqrt.f32 %v367_v18 }
 0x1c1   :  { %v592_v40 = vpop.eup %591 }
 0x1c2   :  { %v259_v41 = vmul.f32 %v592_v40, %v235_v38 }
 0x1c4   :  { %v264_v42 = vrot.slane %v259_v41, %v1055_v39 }
 0x1c6   :  { %v266_v44 = vmul.f32 %v264_v42, %v247_v25  ;;  %v594_v25 = vpop.eup %593 }
 0x1c7   :  { %v369_v27 = vmul.f32 %v594_v25, %v347_v26 }
 0x1c8   :  { %v273_v45 = vadd.f32 %v522_v43, %v266_v44 }
 0x1c9   :  { %v374_v29 = vrot.slane %v369_v27, %v1055_v39 }
 0x1ca   :  { %v274_v46 = vmax.f32 %v273_v45, 0.0 }
 0x1cb   :  { %v376_v32 = vmul.f32 %v374_v29, %v357_v57 }
 0x1cc   :  { %561 = vmatmul.mubr.msk.f32.vlgmr.msra.gmra.mrb[0].mxu0 %vm237_vm2, %v274_v46 }
 0x1cd   :  { %v383_v37 = vadd.f32 %v524_v34, %v376_v32 }
 0x29f   :  { %v457_v61 = vpop.f32.mrb[0].mxu0 }
 0x2a0   :  { %v463_v63 = vsel %vm237_vm2, %v457_v61, 0.0  ;;  %v562_v0 = vpop.f32.mrb[1].mxu0 }
 0x2a1   :  { %v464_v1 = vrot.slane %v463_v63, 4 }
 0x2a3   :  { %v465_v2 = vadd.f32 %v464_v1, %v463_v63 }
 0x2a5   :  { %v466_v4 = vrot.slane %v465_v2, 2 }
 0x2a7   :  { %v467_v5 = vadd.f32 %v466_v4, %v465_v2 }
 0x2a9   :  { %v468_v7 = vrot.slane %v467_v5, 1 }
 0x2ab   :  { %v469_v8 = vadd.f32 %v468_v7, %v467_v5 }
 0x2ad   :  { %v470_v10 = vmul.f32 0.125, %v469_v8 }
 0x2af   :  { %v471_v11 = vsub.f32 %v457_v61, %v470_v10 }
 0x2b1   :  { %v472_v13 = vmul.f32 %v471_v11, %v471_v11 }
 0x2b3   :  { %v473_v14 = vsel %vm237_vm2, %v472_v13, 0.0 }
 0x2b4   :  { %v474_v16 = vrot.slane %v473_v14, 4 }
 0x2b6   :  { %v475_v17 = vadd.f32 %v474_v16, %v473_v14 }
 0x2b8   :  { %v476_v19 = vrot.slane %v475_v17, 2 }
 0x2ba   :  { %v477_v20 = vadd.f32 %v476_v19, %v475_v17 }
 0x2bc   :  { %v478_v21 = vrot.slane %v477_v20, 1 }
 0x2be   :  { %v479_v22 = vadd.f32 %v478_v21, %v477_v20 }
 0x2c0   :  { %v480_v23 = vmul.f32 0.125, %v479_v22 }
 0x2c2   :  { %v481_v24 = vadd.f32 1e-05, %v480_v23 }
 0x2c4   :  { %595 = vrsqrt.f32 %v481_v24 }
 0x2ce   :  { %v596_v30 = vpop.eup %595 }
 0x2cf   :  { %v483_v31 = vmul.f32 %v596_v30, %v461_v28 }
 0x2d1   :  { %v488_v33 = vrot.slane %v483_v31, %v1055_v39 }
 0x2d3   :  { %v490_v36 = vmul.f32 %v488_v33, %v471_v11 }
 0x2d5   :  { %v497_v38 = vadd.f32 %v526_v35, %v490_v36 }
 0x2d7   :  { %v498_v40 = vadd.f32 %v497_v38, %v383_v37 }
 0x2d9   :  { %v499_v41 = vmax.f32 %v498_v40, 0.0 }
 0x2db   :  { %500 = vst.msk [vmem:[#allocation19] sm:$0xff] %vm237_vm2, %v499_v41 }
 0x2dc   :  { %828 = shalt.err (!%p825_p0)
}
 0x2dd   :  { %s829_s19 = scalar_lea.hbm %s1088_s10, 128 }
 0x2de   :  { %p830_p1 = scmp.ne.s32.totalorder %s1088_s10, %s829_s19  ;;  %p833_p2 = scmp.lt.u32.totalorder %s829_s19, %s1088_s10 }
 0x2e0   :  { %p835_p3 = pnand %p833_p2, %p830_p1 }
 0x2e2   :  { %838 = shalt.err (!%p835_p3)
}
 0x2e3   :  { %510 = dma.vmem_to_hbm [thread:$0]  %s508_s18, 128, %s1088_s10, [#allocation4]  }
 0x2e4   :  { %851 = dma.done.wait [#allocation4], 128  }
 0x2e5   :  { %852 = vsyncadd [#allocation4], 4294967168 }
 0x2e6   :  { %514 = vsyncpa [#allocation3], 1 }
 0x2e7   :  { %515 = vsyncpa [#allocation6], 1 }
 0x2e8   :  { %516 = vsyncpa [#allocation9], 1 }
 0x2e9   :  { %517 = vsyncpa [#allocation12], 1 }
 0x2ea   :  { %518 = vsyncpa [#allocation15], 1 }
 0x2eb   :  { %519 = vsyncpa [#allocation18], 1 }
 0x2ec   :  { %520 = vsyncpa [#allocation4], 1 }

</bundles_post_ra>
